<compile_context>
chip_gen: v5e
topology: v5e:2x2
jax: 0.10.0
libtpu: 0.0.40
codegen_flags: <defaults>
</compile_context>

<pallas_src>
import math

import jax
import jax.numpy as jnp
from jax.experimental import pallas as pl
from jax.experimental.pallas import tpu as pltpu

# Model hyper-parameters (small, consistent with a BERT-style encoder layer)
B = 2        # batch
S = 8        # sequence length
D = 32       # d_model (== size)
H = 4        # number of attention heads
DK = D // H  # per-head dim
DFF = 64     # feed-forward hidden dim
EPS = 1e-6


def _layernorm(x, gamma, beta):
    """Matches the PyTorch LayerNorm module: unbiased std, divide by (std+eps).

    Exact divide (review item): the kernel is latency-bound, so the exact
    reciprocal costs nothing and keeps LN error out of everything downstream.
    """
    mean = jnp.mean(x, axis=-1, keepdims=True)
    centered = x - mean
    var_unbiased = jnp.sum(centered * centered, axis=-1, keepdims=True) * (
        1.0 / (x.shape[-1] - 1)
    )
    std = jnp.sqrt(var_unbiased)
    return gamma * (centered / (std + EPS)) + beta


def encoder_layer_kernel(
    bias_ref, x_ref,
    wp_ref, bp_ref, bo_ref,
    g1_ref, be1_ref,
    w1_ref, bf1_ref, w2_ref, bf2_ref,
    g2_ref, be2_ref,
    o_ref,
):
    # Flatten (B, S, D) -> (B*S, D): sublane-only merge, layout-trivial.
    x = x_ref[...].reshape(B * S, D)

    # ---- sublayer 0: self-attention on LayerNorm(x) ----
    xn = _layernorm(x, g1_ref[...], be1_ref[...])

    # One fused MXU push for [Q*scale | K | V'_0 .. V'_{H-1}]:
    #   proj[:, 0:D)              = scaled Q
    #   proj[:, D:2D)             = K
    #   proj[:, 2D+h*D:2D+(h+1)*D) = V'_h = V_h @ Wo_h  (V*O fused offline)
    proj = jnp.dot(xn, wp_ref[...], preferred_element_type=jnp.float32) + bp_ref[...]

    attn_rows = []
    for b in range(B):   # static loop: only the masked softmax is per-batch
        rows = slice(b * S, (b + 1) * S)
        # Hoisted additive mask bias (broadcast once per batch, not per head).
        bias = jnp.broadcast_to(bias_ref[b], (S, S))
        q_b = proj[rows, 0:D]          # already scaled by 1/sqrt(DK)
        k_b = proj[rows, D:2 * D]
        attn_b = jnp.zeros((S, D), jnp.float32)
        for h in range(H):             # static unrolled head loop
            lo, hi = h * DK, (h + 1) * DK
            sc = jnp.dot(q_b[:, lo:hi], k_b[:, lo:hi].T,
                         preferred_element_type=jnp.float32)   # (S, S)
            sc = sc + bias
            sc = sc - jnp.max(sc, axis=-1, keepdims=True)
            p = jnp.exp(sc)
            # approx reciprocal only here (EUP slot, otherwise idle)
            p = p * pl.reciprocal(jnp.sum(p, axis=-1, keepdims=True), approx=True)
            vprime = proj[rows, 2 * D + h * D: 2 * D + (h + 1) * D]   # (S, D)
            attn_b = attn_b + jnp.dot(p, vprime,
                                      preferred_element_type=jnp.float32)
        attn_rows.append(attn_b)

    attn = jnp.concatenate(attn_rows, axis=0) + bo_ref[...]   # (B*S, D)

    x1 = x + attn   # residual (dropout == identity)

    # ---- sublayer 1: feed-forward on LayerNorm(x1) ----
    xn2 = _layernorm(x1, g2_ref[...], be2_ref[...])
    h1 = jnp.maximum(
        jnp.dot(xn2, w1_ref[...], preferred_element_type=jnp.float32) + bf1_ref[...],
        0.0,
    )
    ffn = jnp.dot(h1, w2_ref[...], preferred_element_type=jnp.float32) + bf2_ref[...]

    o_ref[...] = (x1 + ffn).reshape(B, S, D).astype(o_ref.dtype)


def make_params(key):
    ks = jax.random.split(key, 8)
    def lin(k, fan_in, fan_out):
        kw, kb = jax.random.split(k)
        w = jax.random.normal(kw, (fan_in, fan_out), jnp.float32) * 0.05
        b = jax.random.normal(kb, (1, fan_out), jnp.float32) * 0.01
        return w, b
    wq, bq = lin(ks[0], D, D)
    wk, bk = lin(ks[1], D, D)
    wv, bv = lin(ks[2], D, D)
    wo, bo = lin(ks[3], D, D)
    w1, bf1 = lin(ks[4], D, DFF)
    w2, bf2 = lin(ks[5], DFF, D)
    g1, be1 = jnp.ones((1, D), jnp.float32), jnp.zeros((1, D), jnp.float32)
    g2, be2 = jnp.ones((1, D), jnp.float32), jnp.zeros((1, D), jnp.float32)
    return (wq, bq, wk, bk, wv, bv, wo, bo, g1, be1, w1, bf1, w2, bf2, g2, be2)


@jax.jit
def encoder_layer(x, mask, params):
    (wq, bq, wk, bk, wv, bv, wo, bo,
     g1, be1, w1, bf1, w2, bf2, g2, be2) = params

    scale = 1.0 / math.sqrt(DK)

    # Offline per-head V*O fusion (review item):
    #   Wvo_h = Wv[:, h] @ Wo[h, :]   (D, D)
    #   bvo_h = bv[:, h] @ Wo[h, :]   (1, D)   (valid since softmax rows sum to 1)
    wvo = [wv[:, h * DK:(h + 1) * DK] @ wo[h * DK:(h + 1) * DK, :] for h in range(H)]
    bvo = [bv[:, h * DK:(h + 1) * DK] @ wo[h * DK:(h + 1) * DK, :] for h in range(H)]

    # Fused projection weight/bias with the 1/sqrt(DK) scale folded into Q.
    wp = jnp.concatenate([wq * scale, wk] + wvo, axis=1)   # (D, 2D + H*D) = (32, 192)
    bp = jnp.concatenate([bq * scale, bk] + bvo, axis=1)   # (1, 192)

    # Precomputed additive attention-mask bias (robust compare, review item).
    mask_bias = jnp.where(mask < 0.5, -1e9, 0.0).astype(jnp.float32)   # (B, 1, S)

    full = lambda shape: pl.BlockSpec(shape, lambda i: (0,) * len(shape))

    in_specs = [
        full((B, 1, S)),                         # additive mask bias
        full((B, S, D)),                         # x (whole batch, single step)
        full((D, 2 * D + H * D)),                # fused projection weight
        full((1, 2 * D + H * D)),                # fused projection bias
        full((1, D)),                            # bo
        full((1, D)), full((1, D)),              # ln1 gamma, beta
        full((D, DFF)), full((1, DFF)),          # w1, b1
        full((DFF, D)), full((1, D)),            # w2, b2
        full((1, D)), full((1, D)),              # ln2 gamma, beta
    ]

    return pl.pallas_call(
        encoder_layer_kernel,
        out_shape=jax.ShapeDtypeStruct((B, S, D), x.dtype),
        grid_spec=pltpu.PrefetchScalarGridSpec(
            num_scalar_prefetch=0,
            grid=(1,),                           # batch folded into one step
            in_specs=in_specs,
            out_specs=full((B, S, D)),
        ),
        compiler_params=pltpu.CompilerParams(dimension_semantics=("arbitrary",)),
    )(mask_bias, x, wp, bp, bo, g1, be1, w1, bf1, w2, bf2, g2, be2)


def encoder_layer_ref(x, mask, params):
    """Pure-JAX reference mirroring the PyTorch forward semantics."""
    (wq, bq, wk, bk, wv, bv, wo, bo,
     g1, be1, w1, bf1, w2, bf2, g2, be2) = params

    def ln(t, g, b):
        m = jnp.mean(t, axis=-1, keepdims=True)
        c = t - m
        std = jnp.sqrt(jnp.sum(c * c, axis=-1, keepdims=True) / (t.shape[-1] - 1))
        return g * c / (std + EPS) + b

    xn = ln(x, g1, be1)
    q = xn @ wq + bq
    k = xn @ wk + bk
    v = xn @ wv + bv
    qh = q.reshape(B, S, H, DK).transpose(0, 2, 1, 3)
    kh = k.reshape(B, S, H, DK).transpose(0, 2, 1, 3)
    vh = v.reshape(B, S, H, DK).transpose(0, 2, 1, 3)
    sc = jnp.einsum("bhqd,bhkd->bhqk", qh, kh) / math.sqrt(DK)
    sc = jnp.where(mask[:, None, :, :] == 0.0, -1e9, sc)
    p = jax.nn.softmax(sc, axis=-1)
    attn = jnp.einsum("bhqk,bhkd->bhqd", p, vh).transpose(0, 2, 1, 3).reshape(B, S, D)
    attn = attn @ wo + bo
    x1 = x + attn

    xn2 = ln(x1, g2, be2)
    ffn = jnp.maximum(xn2 @ w1 + bf1, 0.0) @ w2 + bf2
    return x1 + ffn


if __name__ == "__main__":
    key = jax.random.PRNGKey(0)
    kx, kp = jax.random.split(key)
    x = jax.random.normal(kx, (B, S, D), jnp.float32)
    # mask: keep all positions for batch 0, mask last 3 positions for batch 1
    mask = jnp.ones((B, 1, S), jnp.float32)
    mask = mask.at[1, 0, S - 3:].set(0.0)

    params = make_params(kp)

    out = encoder_layer(x, mask, params)
    out = jax.block_until_ready(out)

    ref = encoder_layer_ref(x, mask, params)
    assert out.shape == (B, S, D)
    # LayerNorm now uses an exact divide; the only remaining approximation is
    # the EUP approx reciprocal in the softmax denominator, so the tolerance
    # is tightened from 1e-2 to 5e-3.
    assert jnp.allclose(out, ref, atol=5e-3, rtol=5e-3), (
        float(jnp.max(jnp.abs(out - ref)))
    )
    print("KERNEL_OK")
</pallas_src>

<mosaic_0001>
module attributes {stable_mosaic.version = 11 : i64} {
  func.func @encoder_layer_kernel(%arg0: i32, %arg1: memref<2x1x8xf32, #tpu.memory_space<vmem>>, %arg2: memref<2x8x32xf32, #tpu.memory_space<vmem>>, %arg3: memref<32x192xf32, #tpu.memory_space<vmem>>, %arg4: memref<1x192xf32, #tpu.memory_space<vmem>>, %arg5: memref<1x32xf32, #tpu.memory_space<vmem>>, %arg6: memref<1x32xf32, #tpu.memory_space<vmem>>, %arg7: memref<1x32xf32, #tpu.memory_space<vmem>>, %arg8: memref<32x64xf32, #tpu.memory_space<vmem>>, %arg9: memref<1x64xf32, #tpu.memory_space<vmem>>, %arg10: memref<64x32xf32, #tpu.memory_space<vmem>>, %arg11: memref<1x32xf32, #tpu.memory_space<vmem>>, %arg12: memref<1x32xf32, #tpu.memory_space<vmem>>, %arg13: memref<1x32xf32, #tpu.memory_space<vmem>>, %arg14: memref<2x8x32xf32, #tpu.memory_space<vmem>>) attributes {dimension_semantics = [#tpu.dimension_semantics<arbitrary>], iteration_bounds = array<i64: 1>, scalar_prefetch = 0 : i64, scratch_operands = 0 : i64, tpu.core_type = #tpu.core_type<tc>, window_params = [{pipeline_mode = #tpu.pipeline_mode<synchronous>, transform_indices = @transform_0, window_bounds = array<i64: 2, 1, 8>}, {pipeline_mode = #tpu.pipeline_mode<synchronous>, transform_indices = @transform_1, window_bounds = array<i64: 2, 8, 32>}, {pipeline_mode = #tpu.pipeline_mode<synchronous>, transform_indices = @transform_2, window_bounds = array<i64: 32, 192>}, {pipeline_mode = #tpu.pipeline_mode<synchronous>, transform_indices = @transform_3, window_bounds = array<i64: 1, 192>}, {pipeline_mode = #tpu.pipeline_mode<synchronous>, transform_indices = @transform_4, window_bounds = array<i64: 1, 32>}, {pipeline_mode = #tpu.pipeline_mode<synchronous>, transform_indices = @transform_5, window_bounds = array<i64: 1, 32>}, {pipeline_mode = #tpu.pipeline_mode<synchronous>, transform_indices = @transform_6, window_bounds = array<i64: 1, 32>}, {pipeline_mode = #tpu.pipeline_mode<synchronous>, transform_indices = @transform_7, window_bounds = array<i64: 32, 64>}, {pipeline_mode = #tpu.pipeline_mode<synchronous>, transform_indices = @transform_8, window_bounds = array<i64: 1, 64>}, {pipeline_mode = #tpu.pipeline_mode<synchronous>, transform_indices = @transform_9, window_bounds = array<i64: 64, 32>}, {pipeline_mode = #tpu.pipeline_mode<synchronous>, transform_indices = @transform_10, window_bounds = array<i64: 1, 32>}, {pipeline_mode = #tpu.pipeline_mode<synchronous>, transform_indices = @transform_11, window_bounds = array<i64: 1, 32>}, {pipeline_mode = #tpu.pipeline_mode<synchronous>, transform_indices = @transform_12, window_bounds = array<i64: 1, 32>}, {pipeline_mode = #tpu.pipeline_mode<synchronous>, transform_indices = @transform_13, window_bounds = array<i64: 2, 8, 32>}]} {
    %c0 = arith.constant 0 : index
    %c0_0 = arith.constant 0 : index
    %c0_1 = arith.constant 0 : index
    %0 = vector.load %arg2[%c0, %c0_0, %c0_1] : memref<2x8x32xf32, #tpu.memory_space<vmem>>, vector<2x8x32xf32>
    %1 = vector.shape_cast %0 : vector<2x8x32xf32> to vector<16x32xf32>
    %c0_2 = arith.constant 0 : index
    %c0_3 = arith.constant 0 : index
    %2 = vector.load %arg6[%c0_2, %c0_3] : memref<1x32xf32, #tpu.memory_space<vmem>>, vector<1x32xf32>
    %c0_4 = arith.constant 0 : index
    %c0_5 = arith.constant 0 : index
    %3 = vector.load %arg7[%c0_4, %c0_5] : memref<1x32xf32, #tpu.memory_space<vmem>>, vector<1x32xf32>
    %cst = arith.constant dense<0.000000e+00> : vector<16xf32>
    %4 = vector.multi_reduction <add>, %1, %cst [1] : vector<16x32xf32> to vector<16xf32>
    %5 = vector.shape_cast %4 : vector<16xf32> to vector<16x1xf32>
    %cst_6 = arith.constant 3.200000e+01 : f32
    %6 = vector.broadcast %cst_6 : f32 to vector<16x1xf32>
    %7 = arith.divf %5, %6 : vector<16x1xf32>
    %8 = vector.broadcast %7 : vector<16x1xf32> to vector<16x32xf32>
    %9 = arith.subf %1, %8 : vector<16x32xf32>
    %10 = arith.mulf %9, %9 : vector<16x32xf32>
    %cst_7 = arith.constant dense<0.000000e+00> : vector<16xf32>
    %11 = vector.multi_reduction <add>, %10, %cst_7 [1] : vector<16x32xf32> to vector<16xf32>
    %12 = vector.shape_cast %11 : vector<16xf32> to vector<16x1xf32>
    %cst_8 = arith.constant 0.0322580636 : f32
    %13 = vector.broadcast %cst_8 : f32 to vector<16x1xf32>
    %14 = arith.mulf %12, %13 : vector<16x1xf32>
    %15 = math.sqrt %14 : vector<16x1xf32>
    %cst_9 = arith.constant 9.99999997E-7 : f32
    %16 = vector.broadcast %cst_9 : f32 to vector<16x1xf32>
    %17 = arith.addf %15, %16 : vector<16x1xf32>
    %18 = vector.broadcast %17 : vector<16x1xf32> to vector<16x32xf32>
    %19 = arith.divf %9, %18 : vector<16x32xf32>
    %20 = vector.broadcast %2 : vector<1x32xf32> to vector<16x32xf32>
    %21 = arith.mulf %20, %19 : vector<16x32xf32>
    %22 = vector.broadcast %3 : vector<1x32xf32> to vector<16x32xf32>
    %23 = arith.addf %21, %22 : vector<16x32xf32>
    %c0_10 = arith.constant 0 : index
    %c0_11 = arith.constant 0 : index
    %24 = vector.load %arg3[%c0_10, %c0_11] : memref<32x192xf32, #tpu.memory_space<vmem>>, vector<32x192xf32>
    %cst_12 = arith.constant dense<0.000000e+00> : vector<16x192xf32>
    %25 = tpu.matmul %23, %24, %cst_12 {dimension_numbers = #tpu.dot_dimension_numbers<[1], [0], [0], [1], [0, 0, 1, 1], [], []>} : vector<16x32xf32>, vector<32x192xf32>, vector<16x192xf32> -> vector<16x192xf32>
    %c0_13 = arith.constant 0 : index
    %c0_14 = arith.constant 0 : index
    %26 = vector.load %arg4[%c0_13, %c0_14] : memref<1x192xf32, #tpu.memory_space<vmem>>, vector<1x192xf32>
    %27 = vector.broadcast %26 : vector<1x192xf32> to vector<16x192xf32>
    %28 = arith.addf %25, %27 : vector<16x192xf32>
    %c0_15 = arith.constant 0 : index
    %c0_16 = arith.constant 0 : index
    %c0_17 = arith.constant 0 : index
    %29 = vector.load %arg1[%c0_15, %c0_16, %c0_17] : memref<2x1x8xf32, #tpu.memory_space<vmem>>, vector<1x1x8xf32>
    %30 = vector.shape_cast %29 : vector<1x1x8xf32> to vector<1x8xf32>
    %31 = vector.shape_cast %30 : vector<1x8xf32> to vector<1x8xf32>
    %32 = vector.broadcast %31 : vector<1x8xf32> to vector<8x8xf32>
    %33 = vector.extract_strided_slice %28 {offsets = [0, 0], sizes = [8, 32], strides = [1, 1]} : vector<16x192xf32> to vector<8x32xf32>
    %34 = vector.extract_strided_slice %28 {offsets = [0, 32], sizes = [8, 32], strides = [1, 1]} : vector<16x192xf32> to vector<8x32xf32>
    %cst_18 = arith.constant 0.000000e+00 : f32
    %35 = vector.broadcast %cst_18 : f32 to vector<8x32xf32>
    %36 = vector.extract_strided_slice %33 {offsets = [0, 0], sizes = [8, 8], strides = [1, 1]} : vector<8x32xf32> to vector<8x8xf32>
    %37 = vector.extract_strided_slice %34 {offsets = [0, 0], sizes = [8, 8], strides = [1, 1]} : vector<8x32xf32> to vector<8x8xf32>
    %38 = tpu.transpose %37, [1, 0] : vector<8x8xf32> -> vector<8x8xf32>
    %cst_19 = arith.constant dense<0.000000e+00> : vector<8x8xf32>
    %39 = tpu.matmul %36, %38, %cst_19 {dimension_numbers = #tpu.dot_dimension_numbers<[1], [0], [0], [1], [0, 0, 1, 1], [], []>} : vector<8x8xf32>, vector<8x8xf32>, vector<8x8xf32> -> vector<8x8xf32>
    %40 = arith.addf %39, %32 : vector<8x8xf32>
    %cst_20 = arith.constant dense<0xFF800000> : vector<8xf32>
    %41 = vector.multi_reduction <maximumf>, %40, %cst_20 [1] : vector<8x8xf32> to vector<8xf32>
    %42 = vector.shape_cast %41 : vector<8xf32> to vector<8x1xf32>
    %43 = vector.broadcast %42 : vector<8x1xf32> to vector<8x8xf32>
    %44 = arith.subf %40, %43 : vector<8x8xf32>
    %45 = math.exp %44 : vector<8x8xf32>
    %cst_21 = arith.constant dense<0.000000e+00> : vector<8xf32>
    %46 = vector.multi_reduction <add>, %45, %cst_21 [1] : vector<8x8xf32> to vector<8xf32>
    %47 = vector.shape_cast %46 : vector<8xf32> to vector<8x1xf32>
    %48 = tpu.reciprocal %47 {approx = true} : vector<8x1xf32> -> vector<8x1xf32>
    %49 = vector.broadcast %48 : vector<8x1xf32> to vector<8x8xf32>
    %50 = arith.mulf %45, %49 : vector<8x8xf32>
    %51 = vector.extract_strided_slice %28 {offsets = [0, 64], sizes = [8, 32], strides = [1, 1]} : vector<16x192xf32> to vector<8x32xf32>
    %cst_22 = arith.constant dense<0.000000e+00> : vector<8x32xf32>
    %52 = tpu.matmul %50, %51, %cst_22 {dimension_numbers = #tpu.dot_dimension_numbers<[1], [0], [0], [1], [0, 0, 1, 1], [], []>} : vector<8x8xf32>, vector<8x32xf32>, vector<8x32xf32> -> vector<8x32xf32>
    %53 = arith.addf %35, %52 : vector<8x32xf32>
    %54 = vector.extract_strided_slice %33 {offsets = [0, 8], sizes = [8, 8], strides = [1, 1]} : vector<8x32xf32> to vector<8x8xf32>
    %55 = vector.extract_strided_slice %34 {offsets = [0, 8], sizes = [8, 8], strides = [1, 1]} : vector<8x32xf32> to vector<8x8xf32>
    %56 = tpu.transpose %55, [1, 0] : vector<8x8xf32> -> vector<8x8xf32>
    %cst_23 = arith.constant dense<0.000000e+00> : vector<8x8xf32>
    %57 = tpu.matmul %54, %56, %cst_23 {dimension_numbers = #tpu.dot_dimension_numbers<[1], [0], [0], [1], [0, 0, 1, 1], [], []>} : vector<8x8xf32>, vector<8x8xf32>, vector<8x8xf32> -> vector<8x8xf32>
    %58 = arith.addf %57, %32 : vector<8x8xf32>
    %cst_24 = arith.constant dense<0xFF800000> : vector<8xf32>
    %59 = vector.multi_reduction <maximumf>, %58, %cst_24 [1] : vector<8x8xf32> to vector<8xf32>
    %60 = vector.shape_cast %59 : vector<8xf32> to vector<8x1xf32>
    %61 = vector.broadcast %60 : vector<8x1xf32> to vector<8x8xf32>
    %62 = arith.subf %58, %61 : vector<8x8xf32>
    %63 = math.exp %62 : vector<8x8xf32>
    %cst_25 = arith.constant dense<0.000000e+00> : vector<8xf32>
    %64 = vector.multi_reduction <add>, %63, %cst_25 [1] : vector<8x8xf32> to vector<8xf32>
    %65 = vector.shape_cast %64 : vector<8xf32> to vector<8x1xf32>
    %66 = tpu.reciprocal %65 {approx = true} : vector<8x1xf32> -> vector<8x1xf32>
    %67 = vector.broadcast %66 : vector<8x1xf32> to vector<8x8xf32>
    %68 = arith.mulf %63, %67 : vector<8x8xf32>
    %69 = vector.extract_strided_slice %28 {offsets = [0, 96], sizes = [8, 32], strides = [1, 1]} : vector<16x192xf32> to vector<8x32xf32>
    %cst_26 = arith.constant dense<0.000000e+00> : vector<8x32xf32>
    %70 = tpu.matmul %68, %69, %cst_26 {dimension_numbers = #tpu.dot_dimension_numbers<[1], [0], [0], [1], [0, 0, 1, 1], [], []>} : vector<8x8xf32>, vector<8x32xf32>, vector<8x32xf32> -> vector<8x32xf32>
    %71 = arith.addf %53, %70 : vector<8x32xf32>
    %72 = vector.extract_strided_slice %33 {offsets = [0, 16], sizes = [8, 8], strides = [1, 1]} : vector<8x32xf32> to vector<8x8xf32>
    %73 = vector.extract_strided_slice %34 {offsets = [0, 16], sizes = [8, 8], strides = [1, 1]} : vector<8x32xf32> to vector<8x8xf32>
    %74 = tpu.transpose %73, [1, 0] : vector<8x8xf32> -> vector<8x8xf32>
    %cst_27 = arith.constant dense<0.000000e+00> : vector<8x8xf32>
    %75 = tpu.matmul %72, %74, %cst_27 {dimension_numbers = #tpu.dot_dimension_numbers<[1], [0], [0], [1], [0, 0, 1, 1], [], []>} : vector<8x8xf32>, vector<8x8xf32>, vector<8x8xf32> -> vector<8x8xf32>
    %76 = arith.addf %75, %32 : vector<8x8xf32>
    %cst_28 = arith.constant dense<0xFF800000> : vector<8xf32>
    %77 = vector.multi_reduction <maximumf>, %76, %cst_28 [1] : vector<8x8xf32> to vector<8xf32>
    %78 = vector.shape_cast %77 : vector<8xf32> to vector<8x1xf32>
    %79 = vector.broadcast %78 : vector<8x1xf32> to vector<8x8xf32>
    %80 = arith.subf %76, %79 : vector<8x8xf32>
    %81 = math.exp %80 : vector<8x8xf32>
    %cst_29 = arith.constant dense<0.000000e+00> : vector<8xf32>
    %82 = vector.multi_reduction <add>, %81, %cst_29 [1] : vector<8x8xf32> to vector<8xf32>
    %83 = vector.shape_cast %82 : vector<8xf32> to vector<8x1xf32>
    %84 = tpu.reciprocal %83 {approx = true} : vector<8x1xf32> -> vector<8x1xf32>
    %85 = vector.broadcast %84 : vector<8x1xf32> to vector<8x8xf32>
    %86 = arith.mulf %81, %85 : vector<8x8xf32>
    %87 = vector.extract_strided_slice %28 {offsets = [0, 128], sizes = [8, 32], strides = [1, 1]} : vector<16x192xf32> to vector<8x32xf32>
    %cst_30 = arith.constant dense<0.000000e+00> : vector<8x32xf32>
    %88 = tpu.matmul %86, %87, %cst_30 {dimension_numbers = #tpu.dot_dimension_numbers<[1], [0], [0], [1], [0, 0, 1, 1], [], []>} : vector<8x8xf32>, vector<8x32xf32>, vector<8x32xf32> -> vector<8x32xf32>
    %89 = arith.addf %71, %88 : vector<8x32xf32>
    %90 = vector.extract_strided_slice %33 {offsets = [0, 24], sizes = [8, 8], strides = [1, 1]} : vector<8x32xf32> to vector<8x8xf32>
    %91 = vector.extract_strided_slice %34 {offsets = [0, 24], sizes = [8, 8], strides = [1, 1]} : vector<8x32xf32> to vector<8x8xf32>
    %92 = tpu.transpose %91, [1, 0] : vector<8x8xf32> -> vector<8x8xf32>
    %cst_31 = arith.constant dense<0.000000e+00> : vector<8x8xf32>
    %93 = tpu.matmul %90, %92, %cst_31 {dimension_numbers = #tpu.dot_dimension_numbers<[1], [0], [0], [1], [0, 0, 1, 1], [], []>} : vector<8x8xf32>, vector<8x8xf32>, vector<8x8xf32> -> vector<8x8xf32>
    %94 = arith.addf %93, %32 : vector<8x8xf32>
    %cst_32 = arith.constant dense<0xFF800000> : vector<8xf32>
    %95 = vector.multi_reduction <maximumf>, %94, %cst_32 [1] : vector<8x8xf32> to vector<8xf32>
    %96 = vector.shape_cast %95 : vector<8xf32> to vector<8x1xf32>
    %97 = vector.broadcast %96 : vector<8x1xf32> to vector<8x8xf32>
    %98 = arith.subf %94, %97 : vector<8x8xf32>
    %99 = math.exp %98 : vector<8x8xf32>
    %cst_33 = arith.constant dense<0.000000e+00> : vector<8xf32>
    %100 = vector.multi_reduction <add>, %99, %cst_33 [1] : vector<8x8xf32> to vector<8xf32>
    %101 = vector.shape_cast %100 : vector<8xf32> to vector<8x1xf32>
    %102 = tpu.reciprocal %101 {approx = true} : vector<8x1xf32> -> vector<8x1xf32>
    %103 = vector.broadcast %102 : vector<8x1xf32> to vector<8x8xf32>
    %104 = arith.mulf %99, %103 : vector<8x8xf32>
    %105 = vector.extract_strided_slice %28 {offsets = [0, 160], sizes = [8, 32], strides = [1, 1]} : vector<16x192xf32> to vector<8x32xf32>
    %cst_34 = arith.constant dense<0.000000e+00> : vector<8x32xf32>
    %106 = tpu.matmul %104, %105, %cst_34 {dimension_numbers = #tpu.dot_dimension_numbers<[1], [0], [0], [1], [0, 0, 1, 1], [], []>} : vector<8x8xf32>, vector<8x32xf32>, vector<8x32xf32> -> vector<8x32xf32>
    %107 = arith.addf %89, %106 : vector<8x32xf32>
    %c1 = arith.constant 1 : index
    %c0_35 = arith.constant 0 : index
    %c0_36 = arith.constant 0 : index
    %108 = vector.load %arg1[%c1, %c0_35, %c0_36] : memref<2x1x8xf32, #tpu.memory_space<vmem>>, vector<1x1x8xf32>
    %109 = vector.shape_cast %108 : vector<1x1x8xf32> to vector<1x8xf32>
    %110 = vector.shape_cast %109 : vector<1x8xf32> to vector<1x8xf32>
    %111 = vector.broadcast %110 : vector<1x8xf32> to vector<8x8xf32>
    %112 = vector.extract_strided_slice %28 {offsets = [8, 0], sizes = [8, 32], strides = [1, 1]} : vector<16x192xf32> to vector<8x32xf32>
    %113 = vector.extract_strided_slice %28 {offsets = [8, 32], sizes = [8, 32], strides = [1, 1]} : vector<16x192xf32> to vector<8x32xf32>
    %cst_37 = arith.constant 0.000000e+00 : f32
    %114 = vector.broadcast %cst_37 : f32 to vector<8x32xf32>
    %115 = vector.extract_strided_slice %112 {offsets = [0, 0], sizes = [8, 8], strides = [1, 1]} : vector<8x32xf32> to vector<8x8xf32>
    %116 = vector.extract_strided_slice %113 {offsets = [0, 0], sizes = [8, 8], strides = [1, 1]} : vector<8x32xf32> to vector<8x8xf32>
    %117 = tpu.transpose %116, [1, 0] : vector<8x8xf32> -> vector<8x8xf32>
    %cst_38 = arith.constant dense<0.000000e+00> : vector<8x8xf32>
    %118 = tpu.matmul %115, %117, %cst_38 {dimension_numbers = #tpu.dot_dimension_numbers<[1], [0], [0], [1], [0, 0, 1, 1], [], []>} : vector<8x8xf32>, vector<8x8xf32>, vector<8x8xf32> -> vector<8x8xf32>
    %119 = arith.addf %118, %111 : vector<8x8xf32>
    %cst_39 = arith.constant dense<0xFF800000> : vector<8xf32>
    %120 = vector.multi_reduction <maximumf>, %119, %cst_39 [1] : vector<8x8xf32> to vector<8xf32>
    %121 = vector.shape_cast %120 : vector<8xf32> to vector<8x1xf32>
    %122 = vector.broadcast %121 : vector<8x1xf32> to vector<8x8xf32>
    %123 = arith.subf %119, %122 : vector<8x8xf32>
    %124 = math.exp %123 : vector<8x8xf32>
    %cst_40 = arith.constant dense<0.000000e+00> : vector<8xf32>
    %125 = vector.multi_reduction <add>, %124, %cst_40 [1] : vector<8x8xf32> to vector<8xf32>
    %126 = vector.shape_cast %125 : vector<8xf32> to vector<8x1xf32>
    %127 = tpu.reciprocal %126 {approx = true} : vector<8x1xf32> -> vector<8x1xf32>
    %128 = vector.broadcast %127 : vector<8x1xf32> to vector<8x8xf32>
    %129 = arith.mulf %124, %128 : vector<8x8xf32>
    %130 = vector.extract_strided_slice %28 {offsets = [8, 64], sizes = [8, 32], strides = [1, 1]} : vector<16x192xf32> to vector<8x32xf32>
    %cst_41 = arith.constant dense<0.000000e+00> : vector<8x32xf32>
    %131 = tpu.matmul %129, %130, %cst_41 {dimension_numbers = #tpu.dot_dimension_numbers<[1], [0], [0], [1], [0, 0, 1, 1], [], []>} : vector<8x8xf32>, vector<8x32xf32>, vector<8x32xf32> -> vector<8x32xf32>
    %132 = arith.addf %114, %131 : vector<8x32xf32>
    %133 = vector.extract_strided_slice %112 {offsets = [0, 8], sizes = [8, 8], strides = [1, 1]} : vector<8x32xf32> to vector<8x8xf32>
    %134 = vector.extract_strided_slice %113 {offsets = [0, 8], sizes = [8, 8], strides = [1, 1]} : vector<8x32xf32> to vector<8x8xf32>
    %135 = tpu.transpose %134, [1, 0] : vector<8x8xf32> -> vector<8x8xf32>
    %cst_42 = arith.constant dense<0.000000e+00> : vector<8x8xf32>
    %136 = tpu.matmul %133, %135, %cst_42 {dimension_numbers = #tpu.dot_dimension_numbers<[1], [0], [0], [1], [0, 0, 1, 1], [], []>} : vector<8x8xf32>, vector<8x8xf32>, vector<8x8xf32> -> vector<8x8xf32>
    %137 = arith.addf %136, %111 : vector<8x8xf32>
    %cst_43 = arith.constant dense<0xFF800000> : vector<8xf32>
    %138 = vector.multi_reduction <maximumf>, %137, %cst_43 [1] : vector<8x8xf32> to vector<8xf32>
    %139 = vector.shape_cast %138 : vector<8xf32> to vector<8x1xf32>
    %140 = vector.broadcast %139 : vector<8x1xf32> to vector<8x8xf32>
    %141 = arith.subf %137, %140 : vector<8x8xf32>
    %142 = math.exp %141 : vector<8x8xf32>
    %cst_44 = arith.constant dense<0.000000e+00> : vector<8xf32>
    %143 = vector.multi_reduction <add>, %142, %cst_44 [1] : vector<8x8xf32> to vector<8xf32>
    %144 = vector.shape_cast %143 : vector<8xf32> to vector<8x1xf32>
    %145 = tpu.reciprocal %144 {approx = true} : vector<8x1xf32> -> vector<8x1xf32>
    %146 = vector.broadcast %145 : vector<8x1xf32> to vector<8x8xf32>
    %147 = arith.mulf %142, %146 : vector<8x8xf32>
    %148 = vector.extract_strided_slice %28 {offsets = [8, 96], sizes = [8, 32], strides = [1, 1]} : vector<16x192xf32> to vector<8x32xf32>
    %cst_45 = arith.constant dense<0.000000e+00> : vector<8x32xf32>
    %149 = tpu.matmul %147, %148, %cst_45 {dimension_numbers = #tpu.dot_dimension_numbers<[1], [0], [0], [1], [0, 0, 1, 1], [], []>} : vector<8x8xf32>, vector<8x32xf32>, vector<8x32xf32> -> vector<8x32xf32>
    %150 = arith.addf %132, %149 : vector<8x32xf32>
    %151 = vector.extract_strided_slice %112 {offsets = [0, 16], sizes = [8, 8], strides = [1, 1]} : vector<8x32xf32> to vector<8x8xf32>
    %152 = vector.extract_strided_slice %113 {offsets = [0, 16], sizes = [8, 8], strides = [1, 1]} : vector<8x32xf32> to vector<8x8xf32>
    %153 = tpu.transpose %152, [1, 0] : vector<8x8xf32> -> vector<8x8xf32>
    %cst_46 = arith.constant dense<0.000000e+00> : vector<8x8xf32>
    %154 = tpu.matmul %151, %153, %cst_46 {dimension_numbers = #tpu.dot_dimension_numbers<[1], [0], [0], [1], [0, 0, 1, 1], [], []>} : vector<8x8xf32>, vector<8x8xf32>, vector<8x8xf32> -> vector<8x8xf32>
    %155 = arith.addf %154, %111 : vector<8x8xf32>
    %cst_47 = arith.constant dense<0xFF800000> : vector<8xf32>
    %156 = vector.multi_reduction <maximumf>, %155, %cst_47 [1] : vector<8x8xf32> to vector<8xf32>
    %157 = vector.shape_cast %156 : vector<8xf32> to vector<8x1xf32>
    %158 = vector.broadcast %157 : vector<8x1xf32> to vector<8x8xf32>
    %159 = arith.subf %155, %158 : vector<8x8xf32>
    %160 = math.exp %159 : vector<8x8xf32>
    %cst_48 = arith.constant dense<0.000000e+00> : vector<8xf32>
    %161 = vector.multi_reduction <add>, %160, %cst_48 [1] : vector<8x8xf32> to vector<8xf32>
    %162 = vector.shape_cast %161 : vector<8xf32> to vector<8x1xf32>
    %163 = tpu.reciprocal %162 {approx = true} : vector<8x1xf32> -> vector<8x1xf32>
    %164 = vector.broadcast %163 : vector<8x1xf32> to vector<8x8xf32>
    %165 = arith.mulf %160, %164 : vector<8x8xf32>
    %166 = vector.extract_strided_slice %28 {offsets = [8, 128], sizes = [8, 32], strides = [1, 1]} : vector<16x192xf32> to vector<8x32xf32>
    %cst_49 = arith.constant dense<0.000000e+00> : vector<8x32xf32>
    %167 = tpu.matmul %165, %166, %cst_49 {dimension_numbers = #tpu.dot_dimension_numbers<[1], [0], [0], [1], [0, 0, 1, 1], [], []>} : vector<8x8xf32>, vector<8x32xf32>, vector<8x32xf32> -> vector<8x32xf32>
    %168 = arith.addf %150, %167 : vector<8x32xf32>
    %169 = vector.extract_strided_slice %112 {offsets = [0, 24], sizes = [8, 8], strides = [1, 1]} : vector<8x32xf32> to vector<8x8xf32>
    %170 = vector.extract_strided_slice %113 {offsets = [0, 24], sizes = [8, 8], strides = [1, 1]} : vector<8x32xf32> to vector<8x8xf32>
    %171 = tpu.transpose %170, [1, 0] : vector<8x8xf32> -> vector<8x8xf32>
    %cst_50 = arith.constant dense<0.000000e+00> : vector<8x8xf32>
    %172 = tpu.matmul %169, %171, %cst_50 {dimension_numbers = #tpu.dot_dimension_numbers<[1], [0], [0], [1], [0, 0, 1, 1], [], []>} : vector<8x8xf32>, vector<8x8xf32>, vector<8x8xf32> -> vector<8x8xf32>
    %173 = arith.addf %172, %111 : vector<8x8xf32>
    %cst_51 = arith.constant dense<0xFF800000> : vector<8xf32>
    %174 = vector.multi_reduction <maximumf>, %173, %cst_51 [1] : vector<8x8xf32> to vector<8xf32>
    %175 = vector.shape_cast %174 : vector<8xf32> to vector<8x1xf32>
    %176 = vector.broadcast %175 : vector<8x1xf32> to vector<8x8xf32>
    %177 = arith.subf %173, %176 : vector<8x8xf32>
    %178 = math.exp %177 : vector<8x8xf32>
    %cst_52 = arith.constant dense<0.000000e+00> : vector<8xf32>
    %179 = vector.multi_reduction <add>, %178, %cst_52 [1] : vector<8x8xf32> to vector<8xf32>
    %180 = vector.shape_cast %179 : vector<8xf32> to vector<8x1xf32>
    %181 = tpu.reciprocal %180 {approx = true} : vector<8x1xf32> -> vector<8x1xf32>
    %182 = vector.broadcast %181 : vector<8x1xf32> to vector<8x8xf32>
    %183 = arith.mulf %178, %182 : vector<8x8xf32>
    %184 = vector.extract_strided_slice %28 {offsets = [8, 160], sizes = [8, 32], strides = [1, 1]} : vector<16x192xf32> to vector<8x32xf32>
    %cst_53 = arith.constant dense<0.000000e+00> : vector<8x32xf32>
    %185 = tpu.matmul %183, %184, %cst_53 {dimension_numbers = #tpu.dot_dimension_numbers<[1], [0], [0], [1], [0, 0, 1, 1], [], []>} : vector<8x8xf32>, vector<8x32xf32>, vector<8x32xf32> -> vector<8x32xf32>
    %186 = arith.addf %168, %185 : vector<8x32xf32>
    %187 = tpu.concatenate %107, %186 in 0 : vector<8x32xf32>, vector<8x32xf32> -> vector<16x32xf32>
    %c0_54 = arith.constant 0 : index
    %c0_55 = arith.constant 0 : index
    %188 = vector.load %arg5[%c0_54, %c0_55] : memref<1x32xf32, #tpu.memory_space<vmem>>, vector<1x32xf32>
    %189 = vector.broadcast %188 : vector<1x32xf32> to vector<16x32xf32>
    %190 = arith.addf %187, %189 : vector<16x32xf32>
    %191 = arith.addf %1, %190 : vector<16x32xf32>
    %c0_56 = arith.constant 0 : index
    %c0_57 = arith.constant 0 : index
    %192 = vector.load %arg12[%c0_56, %c0_57] : memref<1x32xf32, #tpu.memory_space<vmem>>, vector<1x32xf32>
    %c0_58 = arith.constant 0 : index
    %c0_59 = arith.constant 0 : index
    %193 = vector.load %arg13[%c0_58, %c0_59] : memref<1x32xf32, #tpu.memory_space<vmem>>, vector<1x32xf32>
    %cst_60 = arith.constant dense<0.000000e+00> : vector<16xf32>
    %194 = vector.multi_reduction <add>, %191, %cst_60 [1] : vector<16x32xf32> to vector<16xf32>
    %195 = vector.shape_cast %194 : vector<16xf32> to vector<16x1xf32>
    %cst_61 = arith.constant 3.200000e+01 : f32
    %196 = vector.broadcast %cst_61 : f32 to vector<16x1xf32>
    %197 = arith.divf %195, %196 : vector<16x1xf32>
    %198 = vector.broadcast %197 : vector<16x1xf32> to vector<16x32xf32>
    %199 = arith.subf %191, %198 : vector<16x32xf32>
    %200 = arith.mulf %199, %199 : vector<16x32xf32>
    %cst_62 = arith.constant dense<0.000000e+00> : vector<16xf32>
    %201 = vector.multi_reduction <add>, %200, %cst_62 [1] : vector<16x32xf32> to vector<16xf32>
    %202 = vector.shape_cast %201 : vector<16xf32> to vector<16x1xf32>
    %cst_63 = arith.constant 0.0322580636 : f32
    %203 = vector.broadcast %cst_63 : f32 to vector<16x1xf32>
    %204 = arith.mulf %202, %203 : vector<16x1xf32>
    %205 = math.sqrt %204 : vector<16x1xf32>
    %cst_64 = arith.constant 9.99999997E-7 : f32
    %206 = vector.broadcast %cst_64 : f32 to vector<16x1xf32>
    %207 = arith.addf %205, %206 : vector<16x1xf32>
    %208 = vector.broadcast %207 : vector<16x1xf32> to vector<16x32xf32>
    %209 = arith.divf %199, %208 : vector<16x32xf32>
    %210 = vector.broadcast %192 : vector<1x32xf32> to vector<16x32xf32>
    %211 = arith.mulf %210, %209 : vector<16x32xf32>
    %212 = vector.broadcast %193 : vector<1x32xf32> to vector<16x32xf32>
    %213 = arith.addf %211, %212 : vector<16x32xf32>
    %c0_65 = arith.constant 0 : index
    %c0_66 = arith.constant 0 : index
    %214 = vector.load %arg8[%c0_65, %c0_66] : memref<32x64xf32, #tpu.memory_space<vmem>>, vector<32x64xf32>
    %cst_67 = arith.constant dense<0.000000e+00> : vector<16x64xf32>
    %215 = tpu.matmul %213, %214, %cst_67 {dimension_numbers = #tpu.dot_dimension_numbers<[1], [0], [0], [1], [0, 0, 1, 1], [], []>} : vector<16x32xf32>, vector<32x64xf32>, vector<16x64xf32> -> vector<16x64xf32>
    %c0_68 = arith.constant 0 : index
    %c0_69 = arith.constant 0 : index
    %216 = vector.load %arg9[%c0_68, %c0_69] : memref<1x64xf32, #tpu.memory_space<vmem>>, vector<1x64xf32>
    %217 = vector.broadcast %216 : vector<1x64xf32> to vector<16x64xf32>
    %218 = arith.addf %215, %217 : vector<16x64xf32>
    %cst_70 = arith.constant 0.000000e+00 : f32
    %219 = vector.broadcast %cst_70 : f32 to vector<16x64xf32>
    %220 = arith.maximumf %218, %219 : vector<16x64xf32>
    %c0_71 = arith.constant 0 : index
    %c0_72 = arith.constant 0 : index
    %221 = vector.load %arg10[%c0_71, %c0_72] : memref<64x32xf32, #tpu.memory_space<vmem>>, vector<64x32xf32>
    %cst_73 = arith.constant dense<0.000000e+00> : vector<16x32xf32>
    %222 = tpu.matmul %220, %221, %cst_73 {dimension_numbers = #tpu.dot_dimension_numbers<[1], [0], [0], [1], [0, 0, 1, 1], [], []>} : vector<16x64xf32>, vector<64x32xf32>, vector<16x32xf32> -> vector<16x32xf32>
    %c0_74 = arith.constant 0 : index
    %c0_75 = arith.constant 0 : index
    %223 = vector.load %arg11[%c0_74, %c0_75] : memref<1x32xf32, #tpu.memory_space<vmem>>, vector<1x32xf32>
    %224 = vector.broadcast %223 : vector<1x32xf32> to vector<16x32xf32>
    %225 = arith.addf %222, %224 : vector<16x32xf32>
    %226 = arith.addf %191, %225 : vector<16x32xf32>
    %227 = vector.shape_cast %226 : vector<16x32xf32> to vector<2x8x32xf32>
    %c0_76 = arith.constant 0 : index
    %c0_77 = arith.constant 0 : index
    %c0_78 = arith.constant 0 : index
    %228 = vector.load %arg14[%c0_76, %c0_77, %c0_78] : memref<2x8x32xf32, #tpu.memory_space<vmem>>, vector<2x8x32xf32>
    tpu.vector_store %arg14[%c0_76, %c0_77, %c0_78], %227 {strides = array<i32>} : memref<2x8x32xf32, #tpu.memory_space<vmem>>, vector<2x8x32xf32>,
    return
  }
  func.func @transform_0(%arg0: i32) -> (i32, i32, i32) {
    %c0_i32 = arith.constant 0 : i32
    %c0_i32_0 = arith.constant 0 : i32
    %c0_i32_1 = arith.constant 0 : i32
    %c0_i32_2 = arith.constant 0 : i32
    return %c0_i32, %c0_i32_0, %c0_i32_1 : i32, i32, i32
  }
  func.func @transform_1(%arg0: i32) -> (i32, i32, i32) {
    %c0_i32 = arith.constant 0 : i32
    %c0_i32_0 = arith.constant 0 : i32
    %c0_i32_1 = arith.constant 0 : i32
    %c0_i32_2 = arith.constant 0 : i32
    return %c0_i32, %c0_i32_0, %c0_i32_1 : i32, i32, i32
  }
  func.func @transform_2(%arg0: i32) -> (i32, i32) {
    %c0_i32 = arith.constant 0 : i32
    %c0_i32_0 = arith.constant 0 : i32
    %c0_i32_1 = arith.constant 0 : i32
    return %c0_i32, %c0_i32_0 : i32, i32
  }
  func.func @transform_3(%arg0: i32) -> (i32, i32) {
    %c0_i32 = arith.constant 0 : i32
    %c0_i32_0 = arith.constant 0 : i32
    %c0_i32_1 = arith.constant 0 : i32
    return %c0_i32, %c0_i32_0 : i32, i32
  }
  func.func @transform_4(%arg0: i32) -> (i32, i32) {
    %c0_i32 = arith.constant 0 : i32
    %c0_i32_0 = arith.constant 0 : i32
    %c0_i32_1 = arith.constant 0 : i32
    return %c0_i32, %c0_i32_0 : i32, i32
  }
  func.func @transform_5(%arg0: i32) -> (i32, i32) {
    %c0_i32 = arith.constant 0 : i32
    %c0_i32_0 = arith.constant 0 : i32
    %c0_i32_1 = arith.constant 0 : i32
    return %c0_i32, %c0_i32_0 : i32, i32
  }
  func.func @transform_6(%arg0: i32) -> (i32, i32) {
    %c0_i32 = arith.constant 0 : i32
    %c0_i32_0 = arith.constant 0 : i32
    %c0_i32_1 = arith.constant 0 : i32
    return %c0_i32, %c0_i32_0 : i32, i32
  }
  func.func @transform_7(%arg0: i32) -> (i32, i32) {
    %c0_i32 = arith.constant 0 : i32
    %c0_i32_0 = arith.constant 0 : i32
    %c0_i32_1 = arith.constant 0 : i32
    return %c0_i32, %c0_i32_0 : i32, i32
  }
  func.func @transform_8(%arg0: i32) -> (i32, i32) {
    %c0_i32 = arith.constant 0 : i32
    %c0_i32_0 = arith.constant 0 : i32
    %c0_i32_1 = arith.constant 0 : i32
    return %c0_i32, %c0_i32_0 : i32, i32
  }
  func.func @transform_9(%arg0: i32) -> (i32, i32) {
    %c0_i32 = arith.constant 0 : i32
    %c0_i32_0 = arith.constant 0 : i32
    %c0_i32_1 = arith.constant 0 : i32
    return %c0_i32, %c0_i32_0 : i32, i32
  }
  func.func @transform_10(%arg0: i32) -> (i32, i32) {
    %c0_i32 = arith.constant 0 : i32
    %c0_i32_0 = arith.constant 0 : i32
    %c0_i32_1 = arith.constant 0 : i32
    return %c0_i32, %c0_i32_0 : i32, i32
  }
  func.func @transform_11(%arg0: i32) -> (i32, i32) {
    %c0_i32 = arith.constant 0 : i32
    %c0_i32_0 = arith.constant 0 : i32
    %c0_i32_1 = arith.constant 0 : i32
    return %c0_i32, %c0_i32_0 : i32, i32
  }
  func.func @transform_12(%arg0: i32) -> (i32, i32) {
    %c0_i32 = arith.constant 0 : i32
    %c0_i32_0 = arith.constant 0 : i32
    %c0_i32_1 = arith.constant 0 : i32
    return %c0_i32, %c0_i32_0 : i32, i32
  }
  func.func @transform_13(%arg0: i32) -> (i32, i32, i32) {
    %c0_i32 = arith.constant 0 : i32
    %c0_i32_0 = arith.constant 0 : i32
    %c0_i32_1 = arith.constant 0 : i32
    %c0_i32_2 = arith.constant 0 : i32
    return %c0_i32, %c0_i32_0, %c0_i32_1 : i32, i32, i32
  }
}

</mosaic_0001>

<bundles_post_ra>
// kernel: encoder_layer.1
= control target key start
LH: loop header
LB: loop body
LE: loop exit
PB: predicated region body
PF: predicated region fallthrough
CT: control target
= control target key end

     0   :  { %vm49_vm0 = vcmask 261120   ;;  %s1433_s0 = inlined_call_operand.vmem [shape: f32[2,1,8], index: 0, kind: input, shape index: {}]   ;;  %s1434_s1 = inlined_call_operand.vmem [shape: f32[2,8,32], index: 1, kind: input, shape index: {}]   ;;  %s1435_s2 = inlined_call_operand.vmem [shape: f32[32,192], index: 2, kind: input, shape index: {}]   ;;  %s1436_s3 = inlined_call_operand.vmem [shape: f32[1,192], index: 3, kind: input, shape index: {}]   ;;  %s1437_s4 = inlined_call_operand.vmem [shape: f32[1,32], index: 4, kind: input, shape index: {}]   ;;  %s1438_s5 = inlined_call_operand.vmem [shape: f32[1,32], index: 5, kind: input, shape index: {}]   ;;  %s1439_s6 = inlined_call_operand.vmem [shape: f32[1,32], index: 6, kind: input, shape index: {}]   ;;  %s1440_s7 = inlined_call_operand.vmem [shape: f32[32,64], index: 7, kind: input, shape index: {}]   ;;  %s1441_s8 = inlined_call_operand.vmem [shape: f32[1,64], index: 8, kind: input, shape index: {}]   ;;  %s1442_s9 = inlined_call_operand.vmem [shape: f32[64,32], index: 9, kind: input, shape index: {}]   ;;  %s1443_s10 = inlined_call_operand.vmem [shape: f32[1,32], index: 10, kind: input, shape index: {}]   ;;  %s1444_s11 = inlined_call_operand.vmem [shape: f32[1,32], index: 11, kind: input, shape index: {}]   ;;  %s1445_s12 = inlined_call_operand.vmem [shape: f32[1,32], index: 12, kind: input, shape index: {}]   ;;  %s1446_s13 = inlined_call_operand.hbm [shape: f32[2,8,32], index: 13, kind: output, shape index: {}]  }
   0x1   :  { %v1153_v0 = vld [vmem:[%s1434_s1] sm:$0xff]  ;;  %v1158_v1 = vld [vmem:[%s1434_s1 + $0x8] sm:$0xff] }
   0x2   :  { %v50_v2 = vsel %vm49_vm0, %v1153_v0, 0.0  ;;  %v53_v3 = vsel %vm49_vm0, %v1158_v1, 0.0 }
   0x3   :  { %51 = vadd.xlane.f32.xlu0 %v50_v2  ;;  %54 = vadd.xlane.f32.xlu1 %v53_v3 }
   0x4   :  { %18 = vsyncpa [#allocation3], 0  ;;  %v1067_v4 = vmov 32.0   ;;  %v149_v21 = vld [vmem:[%s1435_s2 + $0x30] sm:$0xff]  ;;  %v150_v22 = vld [vmem:[%s1435_s2 + $0x38] sm:$0xff]  ;;  %s1068_s29 = smov 88  }
   0x5   :  { %991 = vrcp.f32 %v1067_v4  ;;  %v147_v23 = vld [vmem:[%s1435_s2 + $0x20] sm:$0xff]  ;;  %175 = vmatpush.msra.mxu0 %v149_v21  ;;  %198 = vmatpush.msra.mxu1 %v150_v22  ;;  %v148_v24 = vld [vmem:[%s1435_s2 + $0x28] sm:$0xff]  ;;  %v145_v25 = vld [vmem:[%s1435_s2 + $0x10] sm:$0xff]  ;;  %s1069_s30 = smov 120   ;;  %s1070_s14 = smov 32   ;;  %vm216_vm14 = vcmask 64512  }
   0x6   :  { %v146_v26 = vld [vmem:[%s1435_s2 + $0x18] sm:$0xff]  ;;  %v143_v27 = vld [vmem:[%s1435_s2] sm:$0xff]  ;;  %v144_v28 = vld [vmem:[%s1435_s2 + $0x8] sm:$0xff]  ;;  %s1072_s17 = smov 96   ;;  %s1073_s18 = smov 80  }
   0x7   :  { %176 = vmatpush.msra.mxu0 %v147_v23  ;;  %199 = vmatpush.msra.mxu1 %v148_v24  ;;  %v982_v63 = vld [vmem:[%s1438_s5] ss:$0 sm:$0xff]  ;;  %s1074_s19 = smov 72   ;;  %s1075_s20 = smov 104  }
   0x8   :  { %v1219_v23 = vld [vmem:[%s1436_s3] sm:$0x3]  ;;  %s1071_s3 = smov 112   ;;  %s1076_s21 = smov 64  }
   0x9   :  { %177 = vmatpush.msra.mxu0 %v145_v25  ;;  %200 = vmatpush.msra.mxu1 %v146_v26  ;;  %v153_v24 = vperm.slane %v1219_v23, 0  ;;  %s1077_s2 = smov [#allocation2]   ;;  %s924_s5 = sshll.u32 %s1446_s13, 4  ;;  %s925_s5 = int_to_ptr.hbm [resolvable:$true] %s924_s5 }
   0xa   :  { %s922_s27 = sshll.u32 %s1077_s2, 4  ;;  %s923_s27 = int_to_ptr.vmem [resolvable:$true] %s922_s27 }
   0xb   :  { %v992_v5 = vpop.eup %991  ;;  %178 = vmatpush.msra.mxu0 %v143_v27  ;;  %201 = vmatpush.msra.mxu1 %v144_v28 }
   0xc   :  { %v57_v6 = vmul.f32 32.0, %v992_v5  ;;  %vm61_vm1 = vweird.f32 %v992_v5 }
   0xe   :  { %v58_v7 = vsub.f32 1.0, %v57_v6 }
  0x10   :  { %v59_v8 = vmul.f32 %v992_v5, %v58_v7 }
  0x12   :  { %v60_v9 = vadd.f32 %v992_v5, %v59_v8 }
  0x14   :  { %v1164_v10 = vsel %vm61_vm1, %v992_v5, %v60_v9  ;;  %v983_v5 = vld [vmem:[%s1439_s6] ss:$0 sm:$0xff] }
  0x76   :  { %v52_v11 = vpop.xlane.xlu0 %51  ;;  %v55_v12 = vpop.xlane.xlu1 %54 }
  0x77   :  { %v63_v13 = vmul.f32 %v1164_v10, %v52_v11  ;;  %v64_v14 = vmul.f32 %v1164_v10, %v55_v12 }
  0x79   :  { %v1169_v15 = vsub.f32 %v1153_v0, %v63_v13  ;;  %v1172_v16 = vsub.f32 %v1158_v1, %v64_v14 }
  0x7b   :  { %v67_v17 = vmul.f32 %v1169_v15, %v1169_v15  ;;  %v68_v18 = vmul.f32 %v1172_v16, %v1172_v16 }
  0x7d   :  { %v69_v19 = vsel %vm49_vm0, %v67_v17, 0.0  ;;  %v72_v20 = vsel %vm49_vm0, %v68_v18, 0.0 }
  0x7e   :  { %70 = vadd.xlane.f32.xlu0 %v69_v19  ;;  %73 = vadd.xlane.f32.xlu1 %v72_v20 }
  0xf1   :  { %v71_v29 = vpop.xlane.xlu0 %70  ;;  %v74_v36 = vpop.xlane.xlu1 %73 }
  0xf2   :  { %v75_v30 = vmul.f32 0.032258064, %v71_v29  ;;  %v76_v38 = vmul.f32 0.032258064, %v74_v36 }
  0xf4   :  { %993 = vrsqrt.f32 %v75_v30  ;;  %vm84_vm2 = vcmp.eq.f32.partialorder %v75_v30, inf  ;;  %v87_v40 = vand.u32 2147483648, %v75_v30  ;;  %vm86_vm3 = vcmp.eq.f32.partialorder %v75_v30, 0.0 }
  0xf5   :  { %995 = vrsqrt.f32 %v76_v38  ;;  %vm96_vm4 = vcmp.eq.f32.partialorder %v76_v38, inf  ;;  %vm98_vm5 = vcmp.eq.f32.partialorder %v76_v38, 0.0  ;;  %v99_v54 = vand.u32 2147483648, %v76_v38 }
  0xfa   :  { %v994_v31 = vpop.eup %993 }
  0xfb   :  { %v78_v32 = vmul.f32 %v994_v31, %v75_v30  ;;  %v996_v44 = vpop.eup %995 }
  0xfc   :  { %v90_v45 = vmul.f32 %v996_v44, %v76_v38 }
  0xfd   :  { %v79_v33 = vmul.f32 %v994_v31, %v78_v32 }
  0xfe   :  { %v91_v46 = vmul.f32 %v996_v44, %v90_v45 }
  0xff   :  { %v80_v34 = vmul.f32 0.5, %v79_v33 }
 0x100   :  { %v92_v47 = vmul.f32 0.5, %v91_v46 }
 0x101   :  { %v81_v35 = vsub.f32 1.5, %v80_v34 }
 0x102   :  { %v93_v50 = vsub.f32 1.5, %v92_v47 }
 0x103   :  { %v82_v37 = vmul.f32 %v994_v31, %v81_v35 }
 0x104   :  { %v94_v52 = vmul.f32 %v996_v44, %v93_v50 }
 0x105   :  { %v83_v39 = vmul.f32 %v82_v37, %v75_v30 }
 0x106   :  { %v95_v57 = vmul.f32 %v94_v52, %v76_v38 }
 0x107   :  { %v85_v41 = vsel %vm84_vm2, %v75_v30, %v83_v39  ;;  %v1239_v30 = vld [vmem:[%s1433_s0] ss:$0 sm:$0xff] }
 0x108   :  { %v88_v42 = vsel %vm86_vm3, %v87_v40, %v85_v41  ;;  %v97_v59 = vsel %vm96_vm4, %v76_v38, %v95_v57 }
 0x109   :  { %v101_v43 = vadd.f32 1e-06, %v88_v42  ;;  %v100_v61 = vsel %vm98_vm5, %v99_v54, %v97_v59 }
 0x10a   :  { %v102_v2 = vadd.f32 1e-06, %v100_v61 }
 0x10b   :  { %997 = vrcp.f32 %v101_v43  ;;  %v114_v53 = vand.u32 2147483648, %v101_v43  ;;  %v112_v56 = vand.u32 2147483647, %v101_v43  ;;  %vm108_vm7 = vweird.f32 %v101_v43 }
 0x10c   :  { %999 = vrcp.f32 %v102_v2  ;;  %v129_v11 = vand.u32 2147483648, %v102_v2  ;;  %vm123_vm10 = vweird.f32 %v102_v2  ;;  %v127_v13 = vand.u32 2147483647, %v102_v2 }
 0x10d   :  { %v115_v60 = vor.u32 1.1754944e-38, %v114_v53  ;;  %vm113_vm9 = vcmp.eq.f32.partialorder %v112_v56, 8.507059e+37 }
 0x10e   :  { %vm128_vm13 = vcmp.eq.f32.partialorder %v127_v13, 8.507059e+37 }
 0x111   :  { %v998_v48 = vpop.eup %997 }
 0x112   :  { %v104_v49 = vmul.f32 %v998_v48, %v101_v43  ;;  %vm109_vm6 = vweird.f32 %v998_v48  ;;  %v1000_v8 = vpop.eup %999 }
 0x113   :  { %vm110_vm8 = vmor %vm108_vm7, %vm109_vm6  ;;  %v119_v9 = vmul.f32 %v1000_v8, %v102_v2  ;;  %vm124_vm11 = vweird.f32 %v1000_v8  ;;  %vm884_vm6 = vcmask 523264  }
 0x114   :  { %v105_v51 = vsub.f32 1.0, %v104_v49  ;;  %vm125_vm12 = vmor %vm123_vm10, %vm124_vm11 }
 0x115   :  { %v120_v12 = vsub.f32 1.0, %v119_v9 }
 0x116   :  { %v106_v55 = vmul.f32 %v998_v48, %v105_v51 }
 0x117   :  { %v121_v14 = vmul.f32 %v1000_v8, %v120_v12 }
 0x118   :  { %v107_v58 = vadd.f32 %v998_v48, %v106_v55 }
 0x119   :  { %v122_v17 = vadd.f32 %v1000_v8, %v121_v14  ;;  %v154_v14 = vperm.slane %v1219_v23, 1  ;;  %v1311_v23 = vld [vmem:[%s1433_s0 + $0x1] ss:$0 sm:$0xff] }
 0x11a   :  { %v111_v62 = vsel %vm110_vm8, %v998_v48, %v107_v58 }
 0x11b   :  { %v116_v3 = vsel %vm113_vm9, %v115_v60, %v111_v62  ;;  %v126_v18 = vsel %vm125_vm12, %v1000_v8, %v122_v17 }
 0x11c   :  { %v117_v4 = vmul.f32 %v116_v3, %v1169_v15  ;;  %v130_v15 = vor.u32 1.1754944e-38, %v129_v11 }
 0x11e   :  { %v136_v6 = vmul.f32 %v982_v63, %v117_v4  ;;  %v131_v19 = vsel %vm128_vm13, %v130_v15, %v126_v18 }
 0x11f   :  { %v132_v20 = vmul.f32 %v131_v19, %v1172_v16 }
 0x120   :  { %v141_v7 = vadd.f32 %v983_v5, %v136_v6 }
 0x121   :  { %v137_v21 = vmul.f32 %v982_v63, %v132_v20 }
 0x122   :  { %936 = vmatmul.msk.f32.vlgmr.msra.gmra.mxu0 %vm49_vm0, %v141_v7  ;;  %938 = vmatmul.msk.f32.vlgmr.msra.gmra.mxu1 %vm49_vm0, %v141_v7 }
 0x123   :  { %v142_v22 = vadd.f32 %v983_v5, %v137_v21 }
 0x12a   :  { %937 = vmatmul.msk.f32.gmra.mxu0 %vm49_vm0, %v142_v22  ;;  %939 = vmatmul.msk.f32.gmra.mxu1 %vm49_vm0, %v142_v22 }
 0x19f   :  { %v180_v25 = vpop.f32.mrf.mxu0  ;;  %v1251_v41 = vpop.f32.mrf.mxu1 }
 0x1a0   :  { %v1224_v26 = vadd.f32 %v180_v25, %v153_v24  ;;  %v1297_v18 = vadd.f32 %v1251_v41, %v154_v14 }
 0x1a2   :  { %254 = vrot.lane.b32.xlu2 %v1224_v26, %s1068_s29 }
 0x1a7   :  { %v183_v29 = vpop.f32.mrf.mxu0  ;;  %v1254_v44 = vpop.f32.mrf.mxu1 }
 0x1a8   :  { %v1267_v59 = vadd.f32 %v183_v29, %v153_v24  ;;  %v1303_v21 = vadd.f32 %v1254_v44, %v154_v14 }
 0x1aa   :  { %252 = vrot.lane.b32.xlu2 %v1224_v26, %s1069_s30 }
 0x1b2   :  { %291 = vrot.lane.b32.xlu2 %v1224_v26, %s1070_s14 }
 0x1ba   :  { %343 = vrot.lane.b32.xlu2 %v1224_v26, %s1071_s3 }
 0x1fc   :  { %v255_v16 = vpop.permute.xlu2 %254 }
 0x1fd   :  { %942 = vmatpush.xpose.msk.msrb.mxu0 %vm216_vm14, %v255_v16 }
 0x204   :  { %v253_v27 = vpop.permute.xlu2 %252 }
 0x205   :  { %943 = vmatmul.msk.f32.vlgmr.msrb.gmra.mxu0 %vm216_vm14, %v253_v27 }
 0x20c   :  { %v292_v28 = vpop.permute.xlu2 %291 }
 0x20d   :  { %312 = vmatpush.msra.mxu2 %v292_v28 }
 0x214   :  { %v344_v49 = vpop.permute.xlu2 %343 }
 0x282   :  { %v277_v31 = vpop.f32.mrf.mxu0 }
 0x283   :  { %v278_v32 = vadd.f32 %v1239_v30, %v277_v31 }
 0x285   :  { %v280_v33 = vsel %vm216_vm14, %v278_v32, -inf }
 0x286   :  { %281 = vmax.xlane.f32.xlu0 %v280_v33 }
 0x29a   :  { %214 = vrot.lane.b32.xlu0 %v1224_v26, %s1072_s17 }
 0x2f9   :  { %v282_v34 = vpop.xlane.xlu0 %281 }
 0x2fa   :  { %v283_v35 = vsub.f32 %v278_v32, %v282_v34 }
 0x2fc   :  { %v284_v36 = vmul.f32 1.442695, %v283_v35 }
 0x2fe   :  { %1001 = vpow2.f32 %v284_v36 }
 0x304   :  { %v1002_v37 = vpop.eup %1001 }
 0x305   :  { %v286_v38 = vsel %vm216_vm14, %v1002_v37, 0.0 }
 0x306   :  { %287 = vadd.xlane.f32.xlu1 %v286_v38 }
 0x30c   :  { %v215_v39 = vpop.permute.xlu0 %214 }
 0x30d   :  { %940 = vmatpush.xpose.msk.msrb.mxu1 %vm216_vm14, %v215_v39 }
 0x310   :  { %941 = vmatmul.msk.f32.vlgmr.msrb.gmra.mxu1 %vm216_vm14, %v1224_v26 }
 0x31f   :  { %345 = vrot.lane.b32.xlu1 %v1224_v26, %s1073_s18 }
 0x379   :  { %v288_v40 = vpop.xlane.xlu1 %287 }
 0x37a   :  { %1003 = vrcp.f32 %v288_v40 }
 0x380   :  { %v1004_v42 = vpop.eup %1003 }
 0x381   :  { %v290_v43 = vmul.f32 %v1004_v42, %v1002_v37 }
 0x383   :  { %944 = vmatmul.msk.f32.vlgmr.msra.gmra.mxu2 %vm216_vm14, %v290_v43 }
 0x38d   :  { %v238_v45 = vpop.f32.mrf.mxu1 }
 0x38e   :  { %v239_v46 = vadd.f32 %v1239_v30, %v238_v45 }
 0x390   :  { %v241_v47 = vsel %vm216_vm14, %v239_v46, -inf }
 0x391   :  { %v346_v48 = vpop.permute.xlu1 %345  ;;  %242 = vmax.xlane.f32.xlu2 %v241_v47 }
 0x392   :  { %946 = vmatpush.xpose.msk.msrb.mxu2 %vm216_vm14, %v346_v48 }
 0x395   :  { %947 = vmatmul.msk.f32.vlgmr.msrb.gmra.mxu2 %vm216_vm14, %v344_v49 }
 0x404   :  { %v243_v50 = vpop.xlane.xlu2 %242 }
 0x405   :  { %v244_v51 = vsub.f32 %v239_v46, %v243_v50 }
 0x406   :  { %v1260_v54 = vpop.f32.mrf.mxu2 }
 0x407   :  { %v245_v52 = vmul.f32 1.442695, %v244_v51 }
 0x409   :  { %1005 = vpow2.f32 %v245_v52 }
 0x40f   :  { %v1006_v53 = vpop.eup %1005 }
 0x410   :  { %v247_v55 = vsel %vm216_vm14, %v1006_v53, 0.0 }
 0x411   :  { %248 = vadd.xlane.f32.xlu1 %v247_v55 }
 0x418   :  { %v368_v56 = vpop.f32.mrf.mxu2 }
 0x419   :  { %v369_v57 = vadd.f32 %v1239_v30, %v368_v56 }
 0x41b   :  { %v371_v58 = vsel %vm216_vm14, %v369_v57, -inf }
 0x41c   :  { %372 = vmax.xlane.f32.xlu0 %v371_v58 }
 0x42a   :  { %516 = vrot.lane.b32.xlu1 %v1267_v59, %s1069_s30 }
 0x430   :  { %518 = vrot.lane.b32.xlu0 %v1267_v59, %s1068_s29 }
 0x438   :  { %479 = vrot.lane.b32.xlu0 %v1267_v59, %s1072_s17 }
 0x440   :  { %408 = vrot.lane.b32.xlu0 %v1224_v26, %s1074_s19 }
 0x448   :  { %609 = vrot.lane.b32.xlu0 %v1267_v59, %s1073_s18 }
 0x450   :  { %406 = vrot.lane.b32.xlu0 %v1224_v26, %s1075_s20 }
 0x458   :  { %607 = vrot.lane.b32.xlu0 %v1267_v59, %s1071_s3 }
 0x460   :  { %555 = vrot.lane.b32.xlu0 %v1267_v59, %s1070_s14 }
 0x468   :  { %670 = vrot.lane.b32.xlu0 %v1267_v59, %s1075_s20 }
 0x484   :  { %v249_v11 = vpop.xlane.xlu1 %248 }
 0x48f   :  { %v373_v60 = vpop.xlane.xlu0 %372 }
 0x490   :  { %v374_v61 = vsub.f32 %v369_v57, %v373_v60 }
 0x492   :  { %v375_v62 = vmul.f32 1.442695, %v374_v61 }
 0x494   :  { %1007 = vpow2.f32 %v375_v62 }
 0x495   :  { %1009 = vrcp.f32 %v249_v11 }
 0x49a   :  { %v1008_v63 = vpop.eup %1007 }
 0x49b   :  { %v377_v2 = vsel %vm216_vm14, %v1008_v63, 0.0  ;;  %v1010_v13 = vpop.eup %1009 }
 0x49c   :  { %378 = vadd.xlane.f32.xlu2 %v377_v2  ;;  %v251_v17 = vmul.f32 %v1010_v13, %v1006_v53  ;;  %v517_v22 = vpop.permute.xlu1 %516 }
 0x4a2   :  { %v519_v3 = vpop.permute.xlu0 %518 }
 0x4aa   :  { %v480_v4 = vpop.permute.xlu0 %479 }
 0x4ab   :  { %953 = vmatpush.xpose.msk.msra.mxu2 %vm216_vm14, %v480_v4 }
 0x4ae   :  { %954 = vmatmul.msk.f32.vlgmr.msra.gmra.mxu2 %vm216_vm14, %v1267_v59 }
 0x4b2   :  { %v409_v5 = vpop.permute.xlu0 %408 }
 0x4b3   :  { %949 = vmatpush.xpose.msk.msra.mxu0 %vm216_vm14, %v409_v5 }
 0x4b4   :  { %317 = vrot.lane.b32.xlu2 %v1224_v26, %s1076_s21 }
 0x4ba   :  { %v610_v6 = vpop.permute.xlu0 %609 }
 0x4bb   :  { %959 = vmatpush.xpose.msk.msrb.mxu2 %vm216_vm14, %v610_v6 }
 0x4c2   :  { %v407_v7 = vpop.permute.xlu0 %406 }
 0x4c3   :  { %950 = vmatmul.msk.f32.vlgmr.msra.gmra.mxu0 %vm216_vm14, %v407_v7 }
 0x4ca   :  { %v608_v8 = vpop.permute.xlu0 %607 }
 0x4cb   :  { %960 = vmatmul.msk.f32.vlgmr.msrb.gmra.mxu2 %vm216_vm14, %v608_v8 }
 0x4d2   :  { %v556_v9 = vpop.permute.xlu0 %555 }
 0x4d3   :  { %576 = vmatpush.msrb.mxu0 %v556_v9 }
 0x4da   :  { %v671_v46 = vpop.permute.xlu0 %670 }
 0x50f   :  { %v379_v12 = vpop.xlane.xlu2 %378 }
 0x510   :  { %1011 = vrcp.f32 %v379_v12 }
 0x516   :  { %v1012_v19 = vpop.eup %1011 }
 0x517   :  { %v318_v15 = vpop.permute.xlu2 %317  ;;  %v381_v20 = vmul.f32 %v1012_v19, %v1008_v63 }
 0x518   :  { %338 = vmatpush.msra.mxu3 %v318_v15 }
 0x519   :  { %945 = vmatmul.msk.f32.vlgmr.msra.gmra.mxu3 %vm216_vm14, %v251_v17 }
 0x51a   :  { %400 = vmatpush.msrb.mxu3 %v1297_v18 }
 0x51c   :  { %955 = vmatpush.xpose.msk.msra.mxu3 %vm216_vm14, %v519_v3 }
 0x521   :  { %948 = vmatmul.msk.f32.vlgmr.msrb.gmra.mxu3 %vm216_vm14, %v381_v20 }
 0x522   :  { %664 = vmatpush.msrb.mxu3 %v1303_v21 }
 0x529   :  { %956 = vmatmul.msk.f32.vlgmr.msra.gmra.mxu3 %vm216_vm14, %v517_v22 }
 0x531   :  { %v502_v24 = vpop.f32.mrf.mxu2 }
 0x532   :  { %v503_v25 = vadd.f32 %v1311_v23, %v502_v24 }
 0x534   :  { %v505_v26 = vsel %vm216_vm14, %v503_v25, -inf }
 0x535   :  { %506 = vmax.xlane.f32.xlu0 %v505_v26 }
 0x540   :  { %v431_v40 = vpop.f32.mrf.mxu0 }
 0x541   :  { %v432_v41 = vadd.f32 %v1239_v30, %v431_v40 }
 0x543   :  { %v434_v42 = vsel %vm216_vm14, %v432_v41, -inf }
 0x54e   :  { %v632_v43 = vpop.f32.mrf.mxu2 }
 0x54f   :  { %v633_v44 = vadd.f32 %v1311_v23, %v632_v43 }
 0x551   :  { %v635_v45 = vsel %vm216_vm14, %v633_v44, -inf }
 0x59c   :  { %v340_v16 = vpop.f32.mrf.mxu3 }
 0x59d   :  { %v341_v27 = vadd.f32 %v340_v16, %v1260_v54 }
 0x5a4   :  { %v402_v28 = vpop.f32.mrf.mxu3 }
 0x5a5   :  { %v1316_v29 = vadd.f32 %v402_v28, %v341_v27 }
 0x5a8   :  { %v507_v49 = vpop.xlane.xlu0 %506 }
 0x5a9   :  { %v508_v30 = vsub.f32 %v503_v25, %v507_v49  ;;  %v986_v25 = vld [vmem:[%s1437_s4] ss:$0 sm:$0xff]  ;;  %v834_v49 = vld [vmem:[%s1440_s7 + $0x8] sm:$0xff] }
 0x5ab   :  { %v509_v54 = vmul.f32 1.442695, %v508_v30 }
 0x5ac   :  { %v541_v31 = vpop.f32.mrf.mxu3 }
 0x5ad   :  { %v542_v32 = vadd.f32 %v1311_v23, %v541_v31 }
 0x5af   :  { %v544_v33 = vsel %vm216_vm14, %v542_v32, -inf }
 0x5b0   :  { %545 = vmax.xlane.f32.xlu2 %v544_v33 }
 0x5c8   :  { %672 = vrot.lane.b32.xlu2 %v1267_v59, %s1074_s19 }
 0x623   :  { %v546_v34 = vpop.xlane.xlu2 %545 }
 0x624   :  { %v547_v35 = vsub.f32 %v542_v32, %v546_v34 }
 0x626   :  { %v548_v36 = vmul.f32 1.442695, %v547_v35 }
 0x628   :  { %1013 = vpow2.f32 %v548_v36 }
 0x62b   :  { %v673_v37 = vpop.permute.xlu2 %672 }
 0x62c   :  { %962 = vmatpush.xpose.msk.msra.mxu0 %vm216_vm14, %v673_v37 }
 0x62e   :  { %v1014_v38 = vpop.eup %1013 }
 0x62f   :  { %v550_v39 = vsel %vm216_vm14, %v1014_v38, 0.0 }
 0x630   :  { %551 = vadd.xlane.f32.xlu1 %v550_v39 }
 0x638   :  { %435 = vmax.xlane.f32.xlu1 %v434_v42 }
 0x640   :  { %636 = vmax.xlane.f32.xlu1 %v635_v45 }
 0x6a3   :  { %v552_v47 = vpop.xlane.xlu1 %551 }
 0x6a4   :  { %1015 = vrcp.f32 %v552_v47  ;;  %v836_v47 = vld [vmem:[%s1440_s7 + $0x18] sm:$0xff] }
 0x6a5   :  { %859 = vmatpush.msra.mxu2 %v836_v47 }
 0x6aa   :  { %v1016_v48 = vpop.eup %1015 }
 0x6ab   :  { %v554_v50 = vmul.f32 %v1016_v48, %v1014_v38  ;;  %v436_v51 = vpop.xlane.xlu1 %435  ;;  %v835_v48 = vld [vmem:[%s1440_s7 + $0x10] sm:$0xff] }
 0x6ac   :  { %v437_v52 = vsub.f32 %v432_v41, %v436_v51  ;;  %860 = vmatpush.msra.mxu2 %v835_v48 }
 0x6ad   :  { %957 = vmatmul.msk.f32.vlgmr.msrb.gmra.mxu0 %vm216_vm14, %v554_v50 }
 0x6ae   :  { %v438_v53 = vmul.f32 1.442695, %v437_v52  ;;  %861 = vmatpush.msra.mxu2 %v834_v49 }
 0x6b0   :  { %1017 = vpow2.f32 %v438_v53 }
 0x6b1   :  { %1019 = vpow2.f32 %v509_v54 }
 0x6b3   :  { %v637_v55 = vpop.xlane.xlu1 %636 }
 0x6b4   :  { %v638_v57 = vsub.f32 %v633_v44, %v637_v55 }
 0x6b5   :  { %963 = vmatmul.msk.f32.vlgmr.msra.gmra.mxu0 %vm216_vm14, %v671_v46 }
 0x6b6   :  { %v1018_v56 = vpop.eup %1017  ;;  %v639_v60 = vmul.f32 1.442695, %v638_v57 }
 0x6b7   :  { %v440_v58 = vsel %vm216_vm14, %v1018_v56, 0.0  ;;  %v1020_v61 = vpop.eup %1019 }
 0x6b8   :  { %441 = vadd.xlane.f32.xlu1 %v440_v58  ;;  %1021 = vpow2.f32 %v639_v60  ;;  %v511_v62 = vsel %vm216_vm14, %v1020_v61, 0.0 }
 0x6be   :  { %v1022_v63 = vpop.eup %1021 }
 0x6bf   :  { %v641_v2 = vsel %vm216_vm14, %v1022_v63, 0.0 }
 0x6c0   :  { %512 = vadd.xlane.f32.xlu1 %v511_v62 }
 0x6c8   :  { %642 = vadd.xlane.f32.xlu1 %v641_v2 }
 0x6e1   :  { %446 = vrot.lane.b32.xlu1 %v1297_v18, %s1072_s17 }
 0x72a   :  { %v578_v3 = vpop.f32.mrf.mxu0 }
 0x72b   :  { %v442_v4 = vpop.xlane.xlu1 %441 }
 0x732   :  { %v695_v5 = vpop.f32.mrf.mxu0 }
 0x733   :  { %v696_v6 = vadd.f32 %v1311_v23, %v695_v5  ;;  %v513_v7 = vpop.xlane.xlu1 %512 }
 0x735   :  { %v698_v8 = vsel %vm216_vm14, %v696_v6, -inf }
 0x736   :  { %699 = vmax.xlane.f32.xlu2 %v698_v8 }
 0x73b   :  { %v643_v9 = vpop.xlane.xlu1 %642 }
 0x73c   :  { %1023 = vrcp.f32 %v643_v9 }
 0x73d   :  { %1025 = vrcp.f32 %v442_v4 }
 0x73e   :  { %1027 = vrcp.f32 %v513_v7 }
 0x742   :  { %v1024_v11 = vpop.eup %1023 }
 0x743   :  { %v645_v12 = vmul.f32 %v1024_v11, %v1022_v63  ;;  %v1026_v13 = vpop.eup %1025  ;;  %v1378_v11 = vld [vmem:[%s1444_s11] ss:$0 sm:$0xff] }
 0x744   :  { %v444_v14 = vmul.f32 %v1026_v13, %v1018_v56  ;;  %v1028_v20 = vpop.eup %1027 }
 0x745   :  { %961 = vmatmul.msk.f32.vlgmr.msrb.gmra.mxu3 %vm216_vm14, %v645_v12  ;;  %v515_v22 = vmul.f32 %v1028_v20, %v1020_v61  ;;  %v877_v20 = vld [vmem:[%s1442_s9 + $0x28] sm:$0xff] }
 0x74e   :  { %581 = vrot.lane.b32.xlu2 %v1267_v59, %s1076_s21 }
 0x753   :  { %v447_v15 = vpop.permute.xlu1 %446 }
 0x754   :  { %467 = vmatpush.msra.mxu1 %v447_v15 }
 0x755   :  { %951 = vmatmul.msk.f32.vlgmr.msra.gmra.mxu1 %vm216_vm14, %v444_v14  ;;  %v1383_v14 = vld [vmem:[%s1445_s12] ss:$0 sm:$0xff] }
 0x7a9   :  { %v700_v17 = vpop.xlane.xlu2 %699 }
 0x7aa   :  { %v701_v18 = vsub.f32 %v696_v6, %v700_v17 }
 0x7ac   :  { %v702_v19 = vmul.f32 1.442695, %v701_v18  ;;  %v879_v18 = vld [vmem:[%s1442_s9 + $0x38] sm:$0xff] }
 0x7ad   :  { %899 = vmatpush.msra.mxu3 %v879_v18 }
 0x7ae   :  { %1029 = vpow2.f32 %v702_v19  ;;  %v878_v19 = vld [vmem:[%s1442_s9 + $0x30] sm:$0xff] }
 0x7af   :  { %900 = vmatpush.msra.mxu3 %v878_v19 }
 0x7b1   :  { %v582_v23 = vpop.permute.xlu2 %581  ;;  %901 = vmatpush.msra.mxu3 %v877_v20 }
 0x7b2   :  { %602 = vmatpush.msrb.mxu1 %v582_v23  ;;  %v875_v23 = vld [vmem:[%s1442_s9 + $0x18] sm:$0xff] }
 0x7b3   :  { %958 = vmatmul.msk.f32.vlgmr.msrb.gmra.mxu1 %vm216_vm14, %v515_v22  ;;  %v876_v22 = vld [vmem:[%s1442_s9 + $0x20] sm:$0xff] }
 0x7b4   :  { %v1030_v24 = vpop.eup %1029  ;;  %902 = vmatpush.msra.mxu3 %v876_v22 }
 0x7b5   :  { %v704_v59 = vsel %vm216_vm14, %v1030_v24, 0.0 }
 0x7b6   :  { %705 = vadd.xlane.f32.xlu0 %v704_v59  ;;  %903 = vmatpush.msra.mxu3 %v875_v23 }
 0x7c8   :  { %v666_v40 = vpop.f32.mrf.mxu3 }
 0x7ca   :  { %710 = vrot.lane.b32.xlu0 %v1303_v21, %s1072_s17 }
 0x7d2   :  { %v469_v26 = vpop.f32.mrf.mxu1 }
 0x7d3   :  { %v472_v16 = vadd.f32 %v469_v26, %v1316_v29 }
 0x7d5   :  { %v741_v27 = vadd.f32 %v986_v25, %v472_v16 }
 0x7d7   :  { %v1350_v28 = vadd.f32 %v741_v27, %v1153_v0  ;;  %v874_v27 = vld [vmem:[%s1442_s9 + $0x10] sm:$0xff] }
 0x7d8   :  { %904 = vmatpush.msra.mxu3 %v874_v27 }
 0x7d9   :  { %v747_v31 = vsel %vm49_vm0, %v1350_v28, 0.0 }
 0x7da   :  { %748 = vadd.xlane.f32.xlu1 %v747_v31  ;;  %v873_v31 = vld [vmem:[%s1442_s9 + $0x8] sm:$0xff] }
 0x7db   :  { %905 = vmatpush.msra.mxu3 %v873_v31 }
 0x829   :  { %v706_v32 = vpop.xlane.xlu0 %705 }
 0x82a   :  { %1031 = vrcp.f32 %v706_v32  ;;  %v989_v32 = vld [vmem:[%s1441_s8] ss:$0 sm:$0xff] }
 0x830   :  { %v1032_v33 = vpop.eup %1031  ;;  %v604_v38 = vpop.f32.mrf.mxu1 }
 0x831   :  { %v708_v34 = vmul.f32 %v1032_v33, %v1030_v24  ;;  %v605_v39 = vadd.f32 %v604_v38, %v578_v3 }
 0x833   :  { %v669_v41 = vadd.f32 %v666_v40, %v605_v39 }
 0x83c   :  { %v711_v21 = vpop.permute.xlu0 %710 }
 0x83d   :  { %731 = vmatpush.msra.mxu1 %v711_v21 }
 0x83e   :  { %964 = vmatmul.msk.f32.vlgmr.msra.gmra.mxu1 %vm216_vm14, %v708_v34 }
 0x84d   :  { %v749_v35 = vpop.xlane.xlu1 %748 }
 0x84e   :  { %v753_v36 = vmul.f32 %v749_v35, %v1164_v10 }
 0x850   :  { %v755_v29 = vsub.f32 %v1350_v28, %v753_v36 }
 0x852   :  { %v757_v37 = vmul.f32 %v755_v29, %v755_v29 }
 0x854   :  { %v759_v0 = vsel %vm49_vm0, %v757_v37, 0.0 }
 0x855   :  { %760 = vadd.xlane.f32.xlu2 %v759_v0 }
 0x8bb   :  { %v733_v42 = vpop.f32.mrf.mxu1 }
 0x8bc   :  { %v736_v43 = vadd.f32 %v733_v42, %v669_v41 }
 0x8be   :  { %v742_v44 = vadd.f32 %v986_v25, %v736_v43 }
 0x8c0   :  { %v1359_v45 = vadd.f32 %v742_v44, %v1158_v1  ;;  %v833_v1 = vld [vmem:[%s1440_s7] sm:$0xff]  ;;  %s1079_s7 = smov 8  }
 0x8c1   :  { %862 = vmatpush.msra.mxu2 %v833_v1 }
 0x8c2   :  { %v750_v46 = vsel %vm49_vm0, %v1359_v45, 0.0 }
 0x8c3   :  { %751 = vadd.xlane.f32.xlu0 %v750_v46 }
 0x8c8   :  { %v761_v50 = vpop.xlane.xlu2 %760 }
 0x8c9   :  { %v765_v51 = vmul.f32 0.032258064, %v761_v50 }
 0x8cb   :  { %1033 = vrsqrt.f32 %v765_v51  ;;  %vm774_vm15 = vcmp.eq.f32.partialorder %v765_v51, inf  ;;  %v777_v58 = vand.u32 2147483648, %v765_v51  ;;  %vm776_vm1 = vcmp.eq.f32.partialorder %v765_v51, 0.0 }
 0x8d1   :  { %v1034_v52 = vpop.eup %1033 }
 0x8d2   :  { %v768_v30 = vmul.f32 %v1034_v52, %v765_v51 }
 0x8d4   :  { %v769_v53 = vmul.f32 %v1034_v52, %v768_v30 }
 0x8d6   :  { %v770_v54 = vmul.f32 0.5, %v769_v53 }
 0x8d8   :  { %v771_v55 = vsub.f32 1.5, %v770_v54 }
 0x8da   :  { %v772_v56 = vmul.f32 %v1034_v52, %v771_v55 }
 0x8dc   :  { %v773_v57 = vmul.f32 %v772_v56, %v765_v51 }
 0x8de   :  { %v775_v60 = vsel %vm774_vm15, %v765_v51, %v773_v57 }
 0x8df   :  { %v778_v61 = vsel %vm776_vm1, %v777_v58, %v775_v60  ;;  %v990_v58 = vld [vmem:[%s1443_s10] ss:$0 sm:$0xff]  ;;  %s1078_s10 = smov 128  }
 0x8e0   :  { %v791_v62 = vadd.f32 1e-06, %v778_v61 }
 0x8e2   :  { %1035 = vrcp.f32 %v791_v62  ;;  %v804_v4 = vand.u32 2147483648, %v791_v62  ;;  %v802_v6 = vand.u32 2147483647, %v791_v62  ;;  %vm798_vm3 = vweird.f32 %v791_v62 }
 0x8e4   :  { %v805_v8 = vor.u32 1.1754944e-38, %v804_v4  ;;  %vm803_vm5 = vcmp.eq.f32.partialorder %v802_v6, 8.507059e+37 }
 0x8e8   :  { %v1036_v63 = vpop.eup %1035 }
 0x8e9   :  { %v794_v2 = vmul.f32 %v1036_v63, %v791_v62  ;;  %vm799_vm2 = vweird.f32 %v1036_v63 }
 0x8ea   :  { %vm800_vm4 = vmor %vm798_vm3, %vm799_vm2 }
 0x8eb   :  { %v795_v3 = vsub.f32 1.0, %v794_v2 }
 0x8ed   :  { %v796_v5 = vmul.f32 %v1036_v63, %v795_v3 }
 0x8ef   :  { %v797_v7 = vadd.f32 %v1036_v63, %v796_v5 }
 0x8f1   :  { %v801_v9 = vsel %vm800_vm4, %v1036_v63, %v797_v7 }
 0x8f2   :  { %v806_v12 = vsel %vm803_vm5, %v805_v8, %v801_v9 }
 0x8f3   :  { %v807_v13 = vmul.f32 %v806_v12, %v755_v29 }
 0x8f5   :  { %v826_v15 = vmul.f32 %v1378_v11, %v807_v13 }
 0x8f7   :  { %v831_v17 = vadd.f32 %v1383_v14, %v826_v15 }
 0x8f9   :  { %965 = vmatmul.msk.f32.vlgmr.msra.gmra.mxu2 %vm49_vm0, %v831_v17 }
 0x936   :  { %v752_v24 = vpop.xlane.xlu0 %751 }
 0x937   :  { %v754_v59 = vmul.f32 %v752_v24, %v1164_v10  ;;  %v872_v10 = vld [vmem:[%s1442_s9] sm:$0xff] }
 0x938   :  { %906 = vmatpush.msra.mxu3 %v872_v10 }
 0x939   :  { %v756_v25 = vsub.f32 %v1359_v45, %v754_v59 }
 0x93b   :  { %v758_v26 = vmul.f32 %v756_v25, %v756_v25 }
 0x93d   :  { %v762_v16 = vsel %vm49_vm0, %v758_v26, 0.0 }
 0x93e   :  { %763 = vadd.xlane.f32.xlu1 %v762_v16 }
 0x97c   :  { %v864_v33 = vpop.f32.mrf.mxu2 }
 0x97d   :  { %v865_v34 = vadd.f32 %v989_v32, %v864_v33 }
 0x97f   :  { %v870_v21 = vmax.f32 %v865_v34, 0.0 }
 0x981   :  { %967 = vmatmul.msk.f32.vlgmr.msra.gmra.mxu3 %vm884_vm6, %v870_v21 }
 0x9b1   :  { %v764_v35 = vpop.xlane.xlu1 %763 }
 0x9b2   :  { %v766_v36 = vmul.f32 0.032258064, %v764_v35 }
 0x9b4   :  { %1037 = vrsqrt.f32 %v766_v36  ;;  %vm786_vm7 = vcmp.eq.f32.partialorder %v766_v36, inf  ;;  %v789_v42 = vand.u32 2147483648, %v766_v36  ;;  %vm788_vm8 = vcmp.eq.f32.partialorder %v766_v36, 0.0 }
 0x9ba   :  { %v1038_v29 = vpop.eup %1037 }
 0x9bb   :  { %v780_v37 = vmul.f32 %v1038_v29, %v766_v36 }
 0x9bd   :  { %v781_v0 = vmul.f32 %v1038_v29, %v780_v37 }
 0x9bf   :  { %v782_v38 = vmul.f32 0.5, %v781_v0 }
 0x9c1   :  { %v783_v39 = vsub.f32 1.5, %v782_v38 }
 0x9c3   :  { %v784_v40 = vmul.f32 %v1038_v29, %v783_v39 }
 0x9c5   :  { %v785_v41 = vmul.f32 %v784_v40, %v766_v36 }
 0x9c7   :  { %v787_v43 = vsel %vm786_vm7, %v766_v36, %v785_v41 }
 0x9c8   :  { %v790_v44 = vsel %vm788_vm8, %v789_v42, %v787_v43 }
 0x9c9   :  { %v792_v46 = vadd.f32 1e-06, %v790_v44 }
 0x9cb   :  { %1039 = vrcp.f32 %v792_v46  ;;  %v819_v1 = vand.u32 2147483648, %v792_v46  ;;  %v817_v51 = vand.u32 2147483647, %v792_v46  ;;  %vm813_vm10 = vweird.f32 %v792_v46 }
 0x9cd   :  { %v820_v30 = vor.u32 1.1754944e-38, %v819_v1  ;;  %vm818_vm12 = vcmp.eq.f32.partialorder %v817_v51, 8.507059e+37 }
 0x9d1   :  { %v1040_v47 = vpop.eup %1039 }
 0x9d2   :  { %v809_v48 = vmul.f32 %v1040_v47, %v792_v46  ;;  %vm814_vm9 = vweird.f32 %v1040_v47 }
 0x9d3   :  { %vm815_vm11 = vmor %vm813_vm10, %vm814_vm9 }
 0x9d4   :  { %v810_v49 = vsub.f32 1.0, %v809_v48 }
 0x9d6   :  { %v811_v50 = vmul.f32 %v1040_v47, %v810_v49 }
 0x9d8   :  { %v812_v52 = vadd.f32 %v1040_v47, %v811_v50 }
 0x9da   :  { %v816_v53 = vsel %vm815_vm11, %v1040_v47, %v812_v52 }
 0x9db   :  { %v821_v54 = vsel %vm818_vm12, %v820_v30, %v816_v53 }
 0x9dc   :  { %v822_v55 = vmul.f32 %v821_v54, %v756_v25 }
 0x9de   :  { %v827_v56 = vmul.f32 %v1378_v11, %v822_v55 }
 0x9e0   :  { %v832_v57 = vadd.f32 %v1383_v14, %v827_v56 }
 0x9e2   :  { %966 = vmatmul.msk.f32.gmra.mxu2 %vm49_vm0, %v832_v57 }
 0xa04   :  { %v908_v60 = vpop.f32.mrf.mxu3 }
 0xa05   :  { %v909_v61 = vadd.f32 %v990_v58, %v908_v60 }
 0xa07   :  { %v914_v62 = vadd.f32 %v909_v61, %v1350_v28 }
 0xa09   :  { %916 = vst.msk [vmem:[#allocation2] sm:$0xff] %vm49_vm0, %v914_v62 }
 0xa65   :  { %v867_v63 = vpop.f32.mrf.mxu2 }
 0xa66   :  { %v868_v2 = vadd.f32 %v989_v32, %v867_v63 }
 0xa68   :  { %v871_v3 = vmax.f32 %v868_v2, 0.0 }
 0xa6a   :  { %968 = vmatmul.msk.f32.gmra.mxu3 %vm884_vm6, %v871_v3 }
 0xaed   :  { %v911_v4 = vpop.f32.mrf.mxu3 }
 0xaee   :  { %v912_v5 = vadd.f32 %v990_v58, %v911_v4 }
 0xaf0   :  { %v915_v6 = vadd.f32 %v912_v5, %v1359_v45 }
 0xaf2   :  { %917 = vst.msk [vmem:[#allocation2 + $0x8] sm:$0xff] %vm49_vm0, %v915_v6 }
 0xaf3   :  { %930 = dma.vmem_to_hbm [thread:$0]  %s923_s27, 256, %s925_s5, [#allocation3], %s1078_s10, %s1078_s10, %s1079_s7  }
 0xaf4   :  { %1065 = dma.done.wait [#allocation3], 256  }
 0xaf5   :  { %1066 = vsyncadd [#allocation3], 4294967040 }
 0xaf6   :  { %935 = vsyncpa [#allocation3], 1 }

</bundles_post_ra>
